<compile_context>
chip_gen: v5e
topology: v5e:2x2
jax: 0.10.0
libtpu: 0.0.40
codegen_flags: <defaults>
</compile_context>

<pallas_src>
import functools

import jax
import jax.numpy as jnp
from jax import lax
from jax.experimental import pallas as pl
from jax.experimental.pallas import tpu as pltpu


def _round_up(x: int, m: int) -> int:
    return (x + m - 1) // m * m


def _hybra_conv_kernel(ar_ref, ai_ref, wr_ref, wi_ref, or_ref, oi_ref, *,
                       left: int, kw: int):
    """Depthwise 'same' cross-correlation for the real & imag filter banks.

    ar_ref, ai_ref : (CT, Wpad)  zero-padded auditory kernels (lanes >= K are 0)
    wr_ref, wi_ref : (CT, kW)    learned kernels (real / imag)
    or_ref, oi_ref : (CT, Wpad)  lane-dense outputs (lanes >= K are junk,
                                 sliced off in the wrapper)
    """
    wpad = or_ref.shape[-1]

    # One full-width load per bank; signal stays in registers for all taps.
    x_r = ar_ref[...]
    x_i = ai_ref[...]
    # Hoisted weight loads: per-tap weights become in-register lane slices.
    w_r = wr_ref[...]
    w_i = wi_ref[...]

    # Cross-correlation (== F.conv1d):  out[c, t] = sum_j x[c, t + j - left] * w[c, j]
    # shifted_j[t] = x[t + j - left] == roll(x, left - j).  Wrapped lanes land
    # in the zero tail because Wpad >= K + max(left, right), so no masks.
    def tap(x, j):
        shift = (left - j) % wpad
        if shift == 0:
            return x
        return pltpu.roll(x, shift=shift, axis=1)   # XLU slot; vld/VALU stay free

    acc_r = tap(x_r, 0) * w_r[:, 0:1]
    acc_i = tap(x_i, 0) * w_i[:, 0:1]
    for j in range(1, kw):
        acc_r = acc_r + tap(x_r, j) * w_r[:, j:j + 1]
        acc_i = acc_i + tap(x_i, j) * w_i[:, j:j + 1]

    # Full-width (lane-dense) stores.
    or_ref[...] = acc_r
    oi_ref[...] = acc_i


def _pick_channel_tile(C: int, wpad: int) -> int:
    """Channel tile: aim for a 2-step grid (v7x's two TCs each take one tile),
    while keeping the fully-unrolled accumulators (2 banks * CT/8 * Wpad/128
    vregs) comfortably inside the 64-vreg file."""
    if C <= 8:
        return C
    vreg_cap = max(8, ((12 * 8 * 128) // max(wpad, 128)) // 8 * 8)
    ct = _round_up(pl.cdiv(C, 2), 8)
    return min(ct, vreg_cap)


@functools.partial(jax.jit, static_argnames=("block_c",))
def hybra_tight_forward(aud_real, aud_imag, learned_real, learned_imag, *,
                        block_c: int | None = None):
    """Pallas implementation of HybrATight.forward().

    aud_real, aud_imag         : (C, 1, K)  float32 buffers
    learned_real, learned_imag : (C, 1, kW) float32 parameters
    returns                    : (C, 1, K)  complex64
    """
    C, _, K = aud_real.shape
    kW = learned_real.shape[-1]

    # F.conv1d(padding='same', stride=1): total pad = kW - 1, left = total // 2,
    # the extra element (even kW) goes on the right (PyTorch convention).
    left = (kW - 1) // 2
    right = (kW - 1) - left

    # Lane-dense working width with enough zero tail that every wrapped roll
    # lane reads a guaranteed zero -> no per-tap masks, no padded scratch.
    wpad = _round_up(K + max(left, right), 128)

    CT = _pick_channel_tile(C, wpad) if block_c is None else max(1, min(block_c, C))
    grid = (pl.cdiv(C, CT),)

    # (C, 1, K) -> (C, Wpad): one tiny fused pad outside the kernel (the only
    # wrapper-side data movement; removes all in-kernel zero/copy traffic).
    pad = ((0, 0), (0, wpad - K))
    ar = jnp.pad(aud_real.reshape(C, K), pad)
    ai = jnp.pad(aud_imag.reshape(C, K), pad)
    wr = learned_real.reshape(C, kW)
    wi = learned_imag.reshape(C, kW)

    kernel = functools.partial(_hybra_conv_kernel, left=left, kw=kW)

    out_r, out_i = pl.pallas_call(
        kernel,
        out_shape=(
            jax.ShapeDtypeStruct((C, wpad), jnp.float32),
            jax.ShapeDtypeStruct((C, wpad), jnp.float32),
        ),
        grid=grid,
        in_specs=[
            pl.BlockSpec((CT, wpad), lambda c: (c, 0)),
            pl.BlockSpec((CT, wpad), lambda c: (c, 0)),
            pl.BlockSpec((CT, kW), lambda c: (c, 0)),
            pl.BlockSpec((CT, kW), lambda c: (c, 0)),
        ],
        out_specs=(
            pl.BlockSpec((CT, wpad), lambda c: (c, 0)),
            pl.BlockSpec((CT, wpad), lambda c: (c, 0)),
        ),
        compiler_params=pltpu.CompilerParams(
            dimension_semantics=("parallel",),     # megacore / v7x dual-TC split
        ),
    )(ar, ai, wr, wi)

    # Slice off lane padding, restore (C, 1, K), assemble complex result.
    hyb_r = out_r[:, :K][:, None, :]
    hyb_i = out_i[:, :K][:, None, :]
    return lax.complex(hyb_r, hyb_i)


def _ref_depthwise_same(x, w, left, right):
    """Pure-JAX reference: grouped conv1d (cross-correlation), padding='same'."""
    C = x.shape[0]
    out = lax.conv_general_dilated(
        x[None],                      # (1, C, K)
        w[:, None, :],                # (C, 1, kW)
        window_strides=(1,),
        padding=[(left, right)],
        dimension_numbers=("NCH", "OIH", "NCH"),
        feature_group_count=C,
    )
    return out[0]


if __name__ == "__main__":
    # Small, module-consistent shapes:
    #   aud_kernels     : (C, 1, K)  complex  -> stored as real/imag buffers
    #   learned_kernels : (C, 1, kW) real parameters (real & imag banks)
    C, K = 16, 96
    d, Ls = 4, 256  # stride / signal length: stored by __init__, unused in forward()

    key = jax.random.PRNGKey(0)
    ok = True
    # Odd and even kernel lengths (even exercises PyTorch's asymmetric 'same' pad).
    for kW in (5, 4):
        key, k1, k2, k3, k4 = jax.random.split(key, 5)
        aud_real = jax.random.normal(k1, (C, 1, K), jnp.float32)
        aud_imag = jax.random.normal(k2, (C, 1, K), jnp.float32)
        # __init__ initializes both banks from the same tensor, but they are
        # independent trainable parameters; exercise them with distinct values.
        learned_real = jax.random.normal(k3, (C, 1, kW), jnp.float32) / kW
        learned_imag = jax.random.normal(k4, (C, 1, kW), jnp.float32) / kW

        hyb = hybra_tight_forward(aud_real, aud_imag, learned_real, learned_imag)
        hyb = jax.block_until_ready(hyb)

        left = (kW - 1) // 2
        right = (kW - 1) - left
        ref_r = _ref_depthwise_same(aud_real[:, 0, :], learned_real[:, 0, :], left, right)
        ref_i = _ref_depthwise_same(aud_imag[:, 0, :], learned_imag[:, 0, :], left, right)
        ref = (ref_r + 1j * ref_i)[:, None, :]

        ok &= hyb.shape == (C, 1, K) and hyb.dtype == jnp.complex64
        ok &= bool(jnp.allclose(hyb, ref, atol=1e-5, rtol=1e-5))

    # TODO(synk): `condition_number` property (frame-operator conditioning over Ls)
    # is not part of forward() and is not implemented here.
    assert ok
    print("KERNEL_OK")
</pallas_src>

<mosaic_0001>
module attributes {stable_mosaic.version = 11 : i64} {
  func.func @_hybra_conv_kernel(%arg0: i32, %arg1: memref<8x128xf32, #tpu.memory_space<vmem>>, %arg2: memref<8x128xf32, #tpu.memory_space<vmem>>, %arg3: memref<8x5xf32, #tpu.memory_space<vmem>>, %arg4: memref<8x5xf32, #tpu.memory_space<vmem>>, %arg5: memref<8x128xf32, #tpu.memory_space<vmem>>, %arg6: memref<8x128xf32, #tpu.memory_space<vmem>>) attributes {dimension_semantics = [#tpu.dimension_semantics<parallel>], iteration_bounds = array<i64: 2>, scalar_prefetch = 0 : i64, scratch_operands = 0 : i64, tpu.core_type = #tpu.core_type<tc>, window_params = [{transform_indices = @transform_0, window_bounds = array<i64: 8, 128>}, {transform_indices = @transform_1, window_bounds = array<i64: 8, 128>}, {transform_indices = @transform_2, window_bounds = array<i64: 8, 5>}, {transform_indices = @transform_3, window_bounds = array<i64: 8, 5>}, {transform_indices = @transform_4, window_bounds = array<i64: 8, 128>}, {transform_indices = @transform_5, window_bounds = array<i64: 8, 128>}]} {
    %c0 = arith.constant 0 : index
    %c0_0 = arith.constant 0 : index
    %0 = vector.load %arg1[%c0, %c0_0] : memref<8x128xf32, #tpu.memory_space<vmem>>, vector<8x128xf32>
    %c0_1 = arith.constant 0 : index
    %c0_2 = arith.constant 0 : index
    %1 = vector.load %arg2[%c0_1, %c0_2] : memref<8x128xf32, #tpu.memory_space<vmem>>, vector<8x128xf32>
    %c0_3 = arith.constant 0 : index
    %c0_4 = arith.constant 0 : index
    %2 = vector.load %arg3[%c0_3, %c0_4] : memref<8x5xf32, #tpu.memory_space<vmem>>, vector<8x5xf32>
    %c0_5 = arith.constant 0 : index
    %c0_6 = arith.constant 0 : index
    %3 = vector.load %arg4[%c0_5, %c0_6] : memref<8x5xf32, #tpu.memory_space<vmem>>, vector<8x5xf32>
    %c2_i32 = arith.constant 2 : i32
    %4 = tpu.dynamic_rotate %0 by %c2_i32 dim 1 : vector<8x128xf32>, i32 -> vector<8x128xf32>
    %5 = vector.extract_strided_slice %2 {offsets = [0, 0], sizes = [8, 1], strides = [1, 1]} : vector<8x5xf32> to vector<8x1xf32>
    %6 = vector.broadcast %5 : vector<8x1xf32> to vector<8x128xf32>
    %7 = arith.mulf %4, %6 : vector<8x128xf32>
    %c2_i32_7 = arith.constant 2 : i32
    %8 = tpu.dynamic_rotate %1 by %c2_i32_7 dim 1 : vector<8x128xf32>, i32 -> vector<8x128xf32>
    %9 = vector.extract_strided_slice %3 {offsets = [0, 0], sizes = [8, 1], strides = [1, 1]} : vector<8x5xf32> to vector<8x1xf32>
    %10 = vector.broadcast %9 : vector<8x1xf32> to vector<8x128xf32>
    %11 = arith.mulf %8, %10 : vector<8x128xf32>
    %c1_i32 = arith.constant 1 : i32
    %12 = tpu.dynamic_rotate %0 by %c1_i32 dim 1 : vector<8x128xf32>, i32 -> vector<8x128xf32>
    %13 = vector.extract_strided_slice %2 {offsets = [0, 1], sizes = [8, 1], strides = [1, 1]} : vector<8x5xf32> to vector<8x1xf32>
    %14 = vector.broadcast %13 : vector<8x1xf32> to vector<8x128xf32>
    %15 = arith.mulf %12, %14 : vector<8x128xf32>
    %16 = arith.addf %7, %15 : vector<8x128xf32>
    %c1_i32_8 = arith.constant 1 : i32
    %17 = tpu.dynamic_rotate %1 by %c1_i32_8 dim 1 : vector<8x128xf32>, i32 -> vector<8x128xf32>
    %18 = vector.extract_strided_slice %3 {offsets = [0, 1], sizes = [8, 1], strides = [1, 1]} : vector<8x5xf32> to vector<8x1xf32>
    %19 = vector.broadcast %18 : vector<8x1xf32> to vector<8x128xf32>
    %20 = arith.mulf %17, %19 : vector<8x128xf32>
    %21 = arith.addf %11, %20 : vector<8x128xf32>
    %22 = vector.extract_strided_slice %2 {offsets = [0, 2], sizes = [8, 1], strides = [1, 1]} : vector<8x5xf32> to vector<8x1xf32>
    %23 = vector.broadcast %22 : vector<8x1xf32> to vector<8x128xf32>
    %24 = arith.mulf %0, %23 : vector<8x128xf32>
    %25 = arith.addf %16, %24 : vector<8x128xf32>
    %26 = vector.extract_strided_slice %3 {offsets = [0, 2], sizes = [8, 1], strides = [1, 1]} : vector<8x5xf32> to vector<8x1xf32>
    %27 = vector.broadcast %26 : vector<8x1xf32> to vector<8x128xf32>
    %28 = arith.mulf %1, %27 : vector<8x128xf32>
    %29 = arith.addf %21, %28 : vector<8x128xf32>
    %c127_i32 = arith.constant 127 : i32
    %30 = tpu.dynamic_rotate %0 by %c127_i32 dim 1 : vector<8x128xf32>, i32 -> vector<8x128xf32>
    %31 = vector.extract_strided_slice %2 {offsets = [0, 3], sizes = [8, 1], strides = [1, 1]} : vector<8x5xf32> to vector<8x1xf32>
    %32 = vector.broadcast %31 : vector<8x1xf32> to vector<8x128xf32>
    %33 = arith.mulf %30, %32 : vector<8x128xf32>
    %34 = arith.addf %25, %33 : vector<8x128xf32>
    %c127_i32_9 = arith.constant 127 : i32
    %35 = tpu.dynamic_rotate %1 by %c127_i32_9 dim 1 : vector<8x128xf32>, i32 -> vector<8x128xf32>
    %36 = vector.extract_strided_slice %3 {offsets = [0, 3], sizes = [8, 1], strides = [1, 1]} : vector<8x5xf32> to vector<8x1xf32>
    %37 = vector.broadcast %36 : vector<8x1xf32> to vector<8x128xf32>
    %38 = arith.mulf %35, %37 : vector<8x128xf32>
    %39 = arith.addf %29, %38 : vector<8x128xf32>
    %c126_i32 = arith.constant 126 : i32
    %40 = tpu.dynamic_rotate %0 by %c126_i32 dim 1 : vector<8x128xf32>, i32 -> vector<8x128xf32>
    %41 = vector.extract_strided_slice %2 {offsets = [0, 4], sizes = [8, 1], strides = [1, 1]} : vector<8x5xf32> to vector<8x1xf32>
    %42 = vector.broadcast %41 : vector<8x1xf32> to vector<8x128xf32>
    %43 = arith.mulf %40, %42 : vector<8x128xf32>
    %44 = arith.addf %34, %43 : vector<8x128xf32>
    %c126_i32_10 = arith.constant 126 : i32
    %45 = tpu.dynamic_rotate %1 by %c126_i32_10 dim 1 : vector<8x128xf32>, i32 -> vector<8x128xf32>
    %46 = vector.extract_strided_slice %3 {offsets = [0, 4], sizes = [8, 1], strides = [1, 1]} : vector<8x5xf32> to vector<8x1xf32>
    %47 = vector.broadcast %46 : vector<8x1xf32> to vector<8x128xf32>
    %48 = arith.mulf %45, %47 : vector<8x128xf32>
    %49 = arith.addf %39, %48 : vector<8x128xf32>
    %c0_11 = arith.constant 0 : index
    %c0_12 = arith.constant 0 : index
    %50 = vector.load %arg5[%c0_11, %c0_12] : memref<8x128xf32, #tpu.memory_space<vmem>>, vector<8x128xf32>
    tpu.vector_store %arg5[%c0_11, %c0_12], %44 {strides = array<i32>} : memref<8x128xf32, #tpu.memory_space<vmem>>, vector<8x128xf32>,
    %c0_13 = arith.constant 0 : index
    %c0_14 = arith.constant 0 : index
    %51 = vector.load %arg6[%c0_13, %c0_14] : memref<8x128xf32, #tpu.memory_space<vmem>>, vector<8x128xf32>
    tpu.vector_store %arg6[%c0_13, %c0_14], %49 {strides = array<i32>} : memref<8x128xf32, #tpu.memory_space<vmem>>, vector<8x128xf32>,
    return
  }
  func.func @transform_0(%arg0: i32) -> (i32, i32) {
    %c0_i32 = arith.constant 0 : i32
    %c0_i32_0 = arith.constant 0 : i32
    return %arg0, %c0_i32 : i32, i32
  }
  func.func @transform_1(%arg0: i32) -> (i32, i32) {
    %c0_i32 = arith.constant 0 : i32
    %c0_i32_0 = arith.constant 0 : i32
    return %arg0, %c0_i32 : i32, i32
  }
  func.func @transform_2(%arg0: i32) -> (i32, i32) {
    %c0_i32 = arith.constant 0 : i32
    %c0_i32_0 = arith.constant 0 : i32
    return %arg0, %c0_i32 : i32, i32
  }
  func.func @transform_3(%arg0: i32) -> (i32, i32) {
    %c0_i32 = arith.constant 0 : i32
    %c0_i32_0 = arith.constant 0 : i32
    return %arg0, %c0_i32 : i32, i32
  }
  func.func @transform_4(%arg0: i32) -> (i32, i32) {
    %c0_i32 = arith.constant 0 : i32
    %c0_i32_0 = arith.constant 0 : i32
    return %arg0, %c0_i32 : i32, i32
  }
  func.func @transform_5(%arg0: i32) -> (i32, i32) {
    %c0_i32 = arith.constant 0 : i32
    %c0_i32_0 = arith.constant 0 : i32
    return %arg0, %c0_i32 : i32, i32
  }
}

</mosaic_0001>

<bundles_post_ra>
// kernel: custom-call
= control target key start
LH: loop header
LB: loop body
LE: loop exit
PB: predicated region body
PF: predicated region fallthrough
CT: control target
= control target key end

     0   :  { %s105_s0 = inlined_call_operand.vmem [shape: f32[16,1,96], index: 0, kind: input, shape index: {}]   ;;  %s106_s1 = inlined_call_operand.vmem [shape: f32[16,1,96], index: 1, kind: input, shape index: {}]   ;;  %s107_s2 = inlined_call_operand.hbm [shape: c64[16,1,96], index: 2, kind: output, shape index: {}]  }
   0x1   :  { %s3_s11 = scalar_lea.hbm %s107_s2, 16 }
   0x2   :  { %4 = vsyncpa [#allocation0], 0  ;;  %s6_s14 = sshll.u32 %s105_s0, 4  ;;  %s8_s17 = sshll.u32 %s107_s2, 4  ;;  %s7_s14 = int_to_ptr.vmem [resolvable:$true] %s6_s14  ;;  %s9_s17 = int_to_ptr.hbm [resolvable:$true] %s8_s17 }
   0x3   :  { %11 = dma.vmem_to_hbm [thread:$0]  %s7_s14, 256, %s9_s17, [#allocation0] }
   0x4   :  { %74 = dma.done.wait [#allocation0], 256  }
   0x5   :  { %75 = vsyncadd [#allocation0], 4294967040 }
   0x6   :  { %14 = vsyncpa [#allocation0], 1 }
   0x7   :  { %15 = vsyncpa [#allocation1], 0  ;;  %s17_s20 = sshll.u32 %s106_s1, 4  ;;  %s19_s21 = sshll.u32 %s3_s11, 4  ;;  %s18_s20 = int_to_ptr.vmem [resolvable:$true] %s17_s20  ;;  %s20_s21 = int_to_ptr.hbm [resolvable:$true] %s19_s21 }
   0x8   :  { %22 = dma.vmem_to_hbm [thread:$0]  %s18_s20, 256, %s20_s21, [#allocation1] }
   0x9   :  { %76 = dma.done.wait [#allocation1], 256  }
   0xa   :  { %77 = vsyncadd [#allocation1], 4294967040 }
   0xb   :  { %25 = vsyncpa [#allocation1], 1 }

// kernel: hybra_tight_forward.1
= control target key start
LH: loop header
LB: loop body
LE: loop exit
PB: predicated region body
PF: predicated region fallthrough
CT: control target
= control target key end

     0   :  { %s570_s18 = smov 0   ;;  %s607_s0 = inlined_call_operand.vmem [shape: f32[16,128], index: 0, kind: input, shape index: {}]   ;;  %s608_s1 = inlined_call_operand.vmem [shape: f32[16,128], index: 1, kind: input, shape index: {}]   ;;  %s609_s2 = inlined_call_operand.vmem [shape: f32[16,5], index: 2, kind: input, shape index: {}]   ;;  %s610_s3 = inlined_call_operand.vmem [shape: f32[16,5], index: 3, kind: input, shape index: {}]   ;;  %s611_s4 = inlined_call_operand.vmem [shape: f32[16,128], index: 4, kind: output, shape index: {0}]   ;;  %s612_s5 = inlined_call_operand.vmem [shape: f32[16,128], index: 5, kind: output, shape index: {1}]  }
   0x1 LB: > { %s484_s19 = sadd.s32 4294967295, %s529_s18   ;;  %p488_p0 = scmp.ge.s32.totalorder %s529_s18, 1  ;;  %s529_s18 = sphi %s570_s18, %s16_s18  }
   0x2   : > { %p216_p1 = scmp.lt.s32.totalorder %s529_s18, 3 }
   0x4   : > { %p217_p2 = pnand %p488_p0, %p216_p1 }
   0x5   : > { %p258_p3 = scmp.lt.s32.totalorder (!%p217_p2), %s484_s19, 1  ;;  %s533_s27 = smov (!%p217_p2), 2  }
   0x6   : > { %220 = sbr.rel (%p217_p2) target bundleno = 184 (0xb8), region = 36  ;;  %s534_s28 = smov (!%p217_p2), 1  }
   0x7   : > { %s537_s10 = smov (!%p217_p2), 127   ;;  %s539_s11 = smov (!%p217_p2), 126  }
   0xb   : > { %v531_v0 = vmov 0   ;;  %s614_s19 = smov (!%p258_p3, %s484_s19), 1  ;;  %v532_v1 = vmov 1   ;;  %v535_v6 = vmov 2   ;;  %v536_v7 = vmov 3  }
   0xc   : > { %515 = vset.pattern.permute.xlu1 %v531_v0  ;;  %514 = vset.pattern.permute.xlu0 %v531_v0  ;;  %s578_s20 = sshll.u32 %s614_s19, 3  ;;  %v538_v8 = vmov 4  }
   0xd   : > { %516 = vset.pattern.permute.xlu2 %v532_v1  ;;  %s265_s23 = scalar_lea.vmem %s608_s1, %s578_s20  ;;  %s261_s26 = scalar_lea.vmem %s607_s0, %s578_s20 }
   0xe   : > { %v283_v2 = vld [vmem:[%s265_s23] sm:$0xff]  ;;  %s273_s6 = scalar_lea.vmem %s610_s3, %s578_s20  ;;  %s269_s9 = scalar_lea.vmem %s609_s2, %s578_s20 }
   0xf   : > { %v282_v3 = vld [vmem:[%s261_s26] sm:$0xff]  ;;  %294 = vrot.lane.b32.xlu1 %v283_v2, %s533_s27  ;;  %s277_s14 = scalar_lea.vmem %s611_s4, %s578_s20  ;;  %s281_s17 = scalar_lea.vmem %s612_s5, %s578_s20 }
  0x10   : > { %286 = vrot.lane.b32.xlu0 %v282_v3, %s533_s27  ;;  %302 = vrot.lane.b32.xlu2 %v282_v3, %s534_s28  ;;  %v285_v4 = vld [vmem:[%s273_s6] sm:$0xff] }
  0x11   : > { %v284_v5 = vld [vmem:[%s269_s9] sm:$0xff] }
  0x17   : > { %298 = vperm.xlu1 %515, %v285_v4  }
  0x18   : > { %290 = vperm.xlu0 %514, %v284_v5   ;;  %305 = vperm.xlu2 %516, %v284_v5  }
  0x1f   : > { %310 = vrot.lane.b32.xlu1 %v283_v2, %s534_s28 }
  0x20   : > { %517 = vset.pattern.permute.xlu0 %v535_v6  ;;  %518 = vset.pattern.permute.xlu1 %v535_v6 }
  0x21   : > { %319 = vperm.xlu0 %517, %v284_v5   ;;  %313 = vperm.xlu2 %516, %v285_v4  }
  0x27   : > { %325 = vperm.xlu1 %518, %v285_v4  }
  0x29   : > { %520 = vset.pattern.permute.xlu0 %v536_v7  ;;  %330 = vrot.lane.b32.xlu2 %v282_v3, %s537_s10 }
  0x2a   : > { %341 = vperm.xlu0 %520, %v285_v4   ;;  %521 = vset.pattern.permute.xlu2 %v538_v8 }
  0x2f   : > { %519 = vset.pattern.permute.xlu1 %v536_v7 }
  0x30   : > { %333 = vperm.xlu1 %519, %v284_v5  }
  0x31   : > { %338 = vrot.lane.b32.xlu2 %v283_v2, %s537_s10 }
  0x32   : > { %522 = vset.pattern.permute.xlu0 %v538_v8 }
  0x38   : > { %346 = vrot.lane.b32.xlu1 %v282_v3, %s539_s11 }
  0x39   : > { %349 = vperm.xlu2 %521, %v284_v5  }
  0x40   : > { %354 = vrot.lane.b32.xlu1 %v283_v2, %s539_s11 }
  0x41   : > { %357 = vperm.xlu2 %521, %v285_v4  }
  0x6a   : > { %v303_v9 = vpop.permute.xlu2 %302 }
  0x72   : > { %v306_v10 = vpop.permute.xlu2 %305 }
  0x73   : > { %v308_v23 = vmul.f32 %v306_v10, %v303_v9 }
  0x7b   : > { %v314_v13 = vpop.permute.xlu2 %313 }
  0x81   : > { %v295_v11 = vpop.permute.xlu1 %294 }
  0x82   : > { %v287_v14 = vpop.permute.xlu0 %286 }
  0x83   : > { %v331_v16 = vpop.permute.xlu2 %330 }
  0x89   : > { %v299_v12 = vpop.permute.xlu1 %298 }
  0x8a   : > { %v291_v17 = vpop.permute.xlu0 %290  ;;  %v301_v31 = vmul.f32 %v299_v12, %v295_v11 }
  0x8b   : > { %v339_v19 = vpop.permute.xlu2 %338  ;;  %v293_v22 = vmul.f32 %v291_v17, %v287_v14 }
  0x8d   : > { %v309_v25 = vadd.f32 %v308_v23, %v293_v22 }
  0x91   : > { %v311_v15 = vpop.permute.xlu1 %310 }
  0x92   : > { %v316_v28 = vmul.f32 %v314_v13, %v311_v15 }
  0x93   : > { %v320_v20 = vpop.permute.xlu0 %319  ;;  %v350_v27 = vpop.permute.xlu2 %349 }
  0x94   : > { %v322_v24 = vmul.f32 %v320_v20, %v282_v3  ;;  %v317_v36 = vadd.f32 %v316_v28, %v301_v31 }
  0x96   : > { %v323_v29 = vadd.f32 %v322_v24, %v309_v25 }
  0x99   : > { %v326_v18 = vpop.permute.xlu1 %325 }
  0x9a   : > { %v328_v32 = vmul.f32 %v326_v18, %v283_v2 }
  0x9b   : > { %v358_v40 = vpop.permute.xlu2 %357 }
  0x9c   : > { %v342_v35 = vpop.permute.xlu0 %341  ;;  %v329_v38 = vadd.f32 %v328_v32, %v317_v36 }
  0x9d   : > { %v344_v39 = vmul.f32 %v342_v35, %v339_v19 }
  0x9f   : > { %v345_v42 = vadd.f32 %v344_v39, %v329_v38 }
  0xa2   : > { %v334_v21 = vpop.permute.xlu1 %333 }
  0xa3   : > { %v336_v26 = vmul.f32 %v334_v21, %v331_v16 }
  0xa5   : > { %v337_v33 = vadd.f32 %v336_v26, %v323_v29 }
  0xaa   : > { %v347_v30 = vpop.permute.xlu1 %346 }
  0xab   : > { %v352_v34 = vmul.f32 %v350_v27, %v347_v30 }
  0xad   : > { %v353_v37 = vadd.f32 %v352_v34, %v337_v33 }
  0xaf   : > { %362 = vst [vmem:[%s277_s14] sm:$0xff] %v353_v37 }
  0xb2   : > { %v355_v41 = vpop.permute.xlu1 %354 }
  0xb3   : > { %v360_v43 = vmul.f32 %v358_v40, %v355_v41 }
  0xb5   : > { %v361_v44 = vadd.f32 %v360_v43, %v345_v42 }
  0xb7   : > { %363 = vst [vmem:[%s281_s17] sm:$0xff] %v361_v44 }
  0xb8 PF: > { %s16_s18 = sadd.s32 1, %s529_s18  }
  0xb9   : > { %p13_p4 = scmp.ge.s32.totalorder %s16_s18, 4  }
  0xbb   :  { %15 = sbr.rel (!%p13_p4) target bundleno = 1 (0x1), region = 87 }

</bundles_post_ra>
